<compile_context>
chip_gen: v7x
topology: tpu7x:2x2x1
jax: 0.10.0
libtpu: 0.0.40
codegen_flags: <defaults>
</compile_context>

<pallas_src>
import functools

import jax
import jax.numpy as jnp
from jax.experimental import pallas as pl
from jax.experimental.pallas import tpu as pltpu


def _ccel_kernel(x_ref, t_ref, o_ref, *, ignore_index, n_rows, block_rows):
    # x_ref: (TN, C) logits block (native dtype), t_ref: (TN, 1) int32 targets,
    # o_ref: (8, 128) per-tile partial (lane 0 = loss_sum, lane 1 = count).
    i = pl.program_id(0)

    x = x_ref[...]                                     # (TN, C), bf16 stays bf16
    t = t_ref[...]                                     # (TN, 1) int32
    tn, c = x.shape

    # Row-wise max in the native dtype (lane-axis reduction -> XLU).
    m = jnp.max(x, axis=1, keepdims=True)              # (TN, 1)

    # One-hot gather of the TARGET LOGIT on the raw tile (before exp), using a
    # single (1, C) lane iota broadcast against t.  Rows whose target is out of
    # range (e.g. ignore_index) select the dtype-min -> e_t = 0 -> p_t = 0,
    # giving a finite log; they are masked out of the sums below anyway.
    cls_ids = jax.lax.broadcasted_iota(jnp.int32, (1, c), 1)
    onehot = cls_ids == t                              # (TN, C) via broadcast
    neg_fill = jnp.finfo(x.dtype).min
    x_t = jnp.max(jnp.where(onehot, x, neg_fill), axis=1, keepdims=True)

    # Softmax denominator: exp + sum in f32 for accuracy; the subtraction stays
    # in the input dtype so the bf16 VPU path is used on v6e/v7x.
    e = jnp.exp((x - m).astype(jnp.float32))           # (TN, C) f32, short-lived
    s = jnp.sum(e, axis=1, keepdims=True)              # (TN, 1) f32
    e_t = jnp.exp((x_t - m).astype(jnp.float32))       # (TN, 1) f32

    # Complement log-prob only at the target class (O(TN) transcendentals;
    # exact reciprocal because log(1 - p_t + 1e-4) is sensitive as p_t -> 1).
    p_t = e_t * pl.reciprocal(s, approx=False)         # (TN, 1)
    logc_t = jnp.log(1.0 - p_t + 0.0001)               # (TN, 1)

    # Valid row = real row (not padding of the last tile) and not ignore_index.
    row_ids = jax.lax.broadcasted_iota(jnp.int32, (tn, 1), 0) + i * block_rows
    valid = jnp.logical_and(row_ids < n_rows, t != ignore_index)

    # jnp.where (not multiply) so NaN/garbage in padded rows cannot leak in.
    loss_sum = jnp.sum(jnp.where(valid, -logc_t, 0.0))
    count = jnp.sum(jnp.where(valid, 1.0, 0.0))

    # Lane-dense partial writeback: lane 0 = loss_sum, lane 1 = count (the value
    # is duplicated across the 8 sublanes; the wrapper only reads row 0).
    lane = jax.lax.broadcasted_iota(jnp.int32, (1, 128), 1)
    row0 = jnp.where(lane == 0, loss_sum, jnp.where(lane == 1, count, 0.0))
    o_ref[...] = jnp.broadcast_to(row0, (8, 128))


def _vmem_limit_bytes():
    # Generation-aware scoped-VMEM limit.
    cap = 64 * 1024 * 1024  # conservative default == v7x per-TC physical VMEM
    try:
        cap = int(getattr(pltpu.get_tpu_info(), "vmem_capacity_bytes", cap))
    except Exception:
        pass
    if cap >= 100 * 1024 * 1024:
        return 96 * 1024 * 1024          # v5e / v6e: 128 MiB physical
    return 48 * 1024 * 1024              # v7x: 64 MiB per TensorCore


def complement_cross_entropy_loss(
    logits, target=None, *, except_index=None, ignore_index=-100, block_rows=None
):
    """logits: (N, C) float array (any float dtype). target: (N,) ints or None."""
    n, c = logits.shape
    if target is None:
        assert except_index is not None
        target = jnp.full((n,), except_index, dtype=jnp.int32)
    target2d = target.astype(jnp.int32).reshape(n, 1)

    vmem_limit = _vmem_limit_bytes()

    if block_rows is None:
        itemsize = jnp.dtype(logits.dtype).itemsize
        # Conservative per-row working-set estimate (bytes):
        #   2 x (C * itemsize)  double-buffered logits input
        #   2 x 512             double-buffered (rows,1) int32 targets, which
        #                       lane-pad to 128 lanes in VMEM (512 B/row)
        #   4 x (C * 4)         full-tile f32 intermediates (exp tile, shifted
        #                       tile, one-hot mask, slack)
        #   10 x 512            (rows,1) f32/i32 vectors, each lane-padded
        per_row = 2 * c * itemsize + 2 * 512 + 4 * c * 4 + 10 * 512
        headroom = 2 * 1024 * 1024
        block_rows = ((vmem_limit - headroom) // per_row) // 8 * 8
        block_rows = max(8, min(int(block_rows), 32768))  # raised cap (was 512)

    block_rows = max(8, (int(block_rows) // 8) * 8)
    block_rows = min(block_rows, pl.cdiv(n, 8) * 8)
    # Keep at least 2 tiles when there is enough work so v7x's two TensorCores
    # both get a share of the "parallel" grid axis.
    if n >= 16:
        block_rows = min(block_rows, max(8, ((n + 1) // 2 + 7) // 8 * 8))
    num_tiles = pl.cdiv(n, block_rows)

    kernel = functools.partial(
        _ccel_kernel,
        ignore_index=ignore_index,
        n_rows=n,
        block_rows=block_rows,
    )

    partials = pl.pallas_call(
        kernel,
        out_shape=jax.ShapeDtypeStruct((num_tiles * 8, 128), jnp.float32),
        grid_spec=pltpu.PrefetchScalarGridSpec(
            num_scalar_prefetch=0,
            grid=(num_tiles,),
            in_specs=[
                pl.BlockSpec((block_rows, c), lambda i: (i, 0)),
                pl.BlockSpec((block_rows, 1), lambda i: (i, 0)),
            ],
            out_specs=pl.BlockSpec((8, 128), lambda i: (i, 0)),
        ),
        compiler_params=pltpu.CompilerParams(
            dimension_semantics=("parallel",),
            vmem_limit_bytes=vmem_limit,
        ),
    )(logits, target2d)

    partials = partials.reshape(num_tiles, 8, 128)
    loss_sum = jnp.sum(partials[:, 0, 0])
    count = jnp.sum(partials[:, 0, 1])
    # size_average=True, reduce=True -> mean over non-ignored rows
    # (NaN when count == 0, matching torch / the reference).
    # NOTE: count is exact in f32 only up to ~2^24 rows.
    return loss_sum / count


def _reference(logits, target, ignore_index=-100):
    # Pure-JAX reference for sanity checking.
    p = jax.nn.softmax(logits.astype(jnp.float32), axis=1)
    logc = jnp.log(1.0 - p + 0.0001)
    idx = jnp.clip(target.astype(jnp.int32), 0, logits.shape[1] - 1)
    picked = jnp.take_along_axis(logc, idx[:, None], axis=1)[:, 0]
    valid = (target != ignore_index).astype(jnp.float32)
    return -jnp.sum(picked * valid) / jnp.sum(valid)


if __name__ == "__main__":
    key = jax.random.PRNGKey(0)
    k1, k2, k3, k4, k5, k6 = jax.random.split(key, 6)

    # Case 1: single tile, explicit targets (CrossEntropy-style usage).
    N, C = 8, 16
    x = jax.random.normal(k1, (N, C), dtype=jnp.float32)
    tgt = jax.random.randint(k2, (N,), 0, C, dtype=jnp.int32)
    loss1 = complement_cross_entropy_loss(x, tgt)
    jax.block_until_ready(loss1)
    ref1 = _reference(x, tgt)
    assert jnp.allclose(loss1, ref1, atol=1e-5, rtol=1e-5), (loss1, ref1)

    # Case 2: target=None -> filled with except_index (complement-class path).
    loss2 = complement_cross_entropy_loss(x, None, except_index=3)
    jax.block_until_ready(loss2)
    ref2 = _reference(x, jnp.full((N,), 3, dtype=jnp.int32))
    assert jnp.allclose(loss2, ref2, atol=1e-5, rtol=1e-5), (loss2, ref2)

    # Case 3: multiple tiles, padded last tile, ignore_index rows — exercises
    # the row-masking / per-tile-partial path (force a small block for test).
    N3, C3 = 20, 32
    x3 = jax.random.normal(k3, (N3, C3), dtype=jnp.float32)
    tgt3 = jax.random.randint(k4, (N3,), 0, C3, dtype=jnp.int32)
    tgt3 = tgt3.at[5].set(-100).at[13].set(-100)
    loss3 = complement_cross_entropy_loss(x3, tgt3, block_rows=8)
    jax.block_until_ready(loss3)
    ref3 = _reference(x3, tgt3)
    assert jnp.allclose(loss3, ref3, atol=1e-5, rtol=1e-5), (loss3, ref3)

    # Case 4: bf16 logits stay bf16 through DMA *and* the elementwise path
    # (max / x - m / one-hot select in bf16; exp + sum in f32).
    xb = x.astype(jnp.bfloat16)
    loss4 = complement_cross_entropy_loss(xb, tgt)
    jax.block_until_ready(loss4)
    ref4 = _reference(xb, tgt)
    assert jnp.allclose(loss4, ref4, atol=2e-2, rtol=2e-2), (loss4, ref4)

    # Case 5: auto tile sizing (no explicit block_rows) with a moderate N —
    # exercises the generation-aware heuristic, the >=2-tile split and the
    # padded last tile together with ignore_index rows.
    N5, C5 = 300, 64
    x5 = jax.random.normal(k5, (N5, C5), dtype=jnp.float32)
    tgt5 = jax.random.randint(k6, (N5,), 0, C5, dtype=jnp.int32)
    tgt5 = tgt5.at[7].set(-100).at[123].set(-100).at[299].set(-100)
    loss5 = complement_cross_entropy_loss(x5, tgt5)
    jax.block_until_ready(loss5)
    ref5 = _reference(x5, tgt5)
    assert jnp.allclose(loss5, ref5, atol=2e-5, rtol=2e-5), (loss5, ref5)

    print("KERNEL_OK")
</pallas_src>

<mosaic_0001>
module attributes {stable_mosaic.version = 11 : i64} {
  func.func @_ccel_kernel(%arg0: i32, %arg1: memref<8x16xf32, #tpu.memory_space<vmem>>, %arg2: memref<8x1xi32, #tpu.memory_space<vmem>>, %arg3: memref<8x128xf32, #tpu.memory_space<vmem>>) attributes {dimension_semantics = [#tpu.dimension_semantics<parallel>], iteration_bounds = array<i64: 1>, scalar_prefetch = 0 : i64, scratch_operands = 0 : i64, tpu.core_type = #tpu.core_type<tc>, window_params = [{transform_indices = @transform_0, window_bounds = array<i64: 8, 16>}, {transform_indices = @transform_1, window_bounds = array<i64: 8, 1>}, {transform_indices = @transform_2, window_bounds = array<i64: 8, 128>}]} {
    %c0 = arith.constant 0 : index
    %c0_0 = arith.constant 0 : index
    %0 = vector.load %arg1[%c0, %c0_0] : memref<8x16xf32, #tpu.memory_space<vmem>>, vector<8x16xf32>
    %c0_1 = arith.constant 0 : index
    %c0_2 = arith.constant 0 : index
    %1 = vector.load %arg2[%c0_1, %c0_2] : memref<8x1xi32, #tpu.memory_space<vmem>>, vector<8x1xi32>
    %cst = arith.constant dense<0xFF800000> : vector<8xf32>
    %2 = vector.multi_reduction <maximumf>, %0, %cst [1] : vector<8x16xf32> to vector<8xf32>
    %3 = vector.shape_cast %2 : vector<8xf32> to vector<8x1xf32>
    %4 = tpu.iota {dimensions = array<i32: 1>} : vector<1x16xi32>
    %5 = vector.broadcast %4 : vector<1x16xi32> to vector<8x16xi32>
    %6 = vector.broadcast %1 : vector<8x1xi32> to vector<8x16xi32>
    %7 = arith.cmpi eq, %5, %6 : vector<8x16xi32>
    %cst_3 = arith.constant -3.40282347E+38 : f32
    %8 = vector.broadcast %cst_3 : f32 to vector<8x16xf32>
    %9 = arith.select %7, %0, %8 : vector<8x16xi1>, vector<8x16xf32>
    %cst_4 = arith.constant dense<0xFF800000> : vector<8xf32>
    %10 = vector.multi_reduction <maximumf>, %9, %cst_4 [1] : vector<8x16xf32> to vector<8xf32>
    %11 = vector.shape_cast %10 : vector<8xf32> to vector<8x1xf32>
    %12 = vector.broadcast %3 : vector<8x1xf32> to vector<8x16xf32>
    %13 = arith.subf %0, %12 : vector<8x16xf32>
    %14 = math.exp %13 : vector<8x16xf32>
    %cst_5 = arith.constant dense<0.000000e+00> : vector<8xf32>
    %15 = vector.multi_reduction <add>, %14, %cst_5 [1] : vector<8x16xf32> to vector<8xf32>
    %16 = vector.shape_cast %15 : vector<8xf32> to vector<8x1xf32>
    %17 = arith.subf %11, %3 : vector<8x1xf32>
    %18 = math.exp %17 : vector<8x1xf32>
    %19 = tpu.reciprocal %16 : vector<8x1xf32> -> vector<8x1xf32>
    %20 = arith.mulf %18, %19 : vector<8x1xf32>
    %cst_6 = arith.constant 1.000000e+00 : f32
    %21 = vector.broadcast %cst_6 : f32 to vector<8x1xf32>
    %22 = arith.subf %21, %20 : vector<8x1xf32>
    %cst_7 = arith.constant 9.99999974E-5 : f32
    %23 = vector.broadcast %cst_7 : f32 to vector<8x1xf32>
    %24 = arith.addf %22, %23 : vector<8x1xf32>
    %25 = math.log %24 : vector<8x1xf32>
    %26 = tpu.iota {dimensions = array<i32: 0>} : vector<8x1xi32>
    %c8_i32 = arith.constant 8 : i32
    %27 = arith.muli %arg0, %c8_i32 : i32
    %28 = vector.broadcast %27 : i32 to vector<8x1xi32>
    %29 = arith.addi %26, %28 : vector<8x1xi32>
    %c8_i32_8 = arith.constant 8 : i32
    %30 = vector.broadcast %c8_i32_8 : i32 to vector<8x1xi32>
    %31 = arith.cmpi slt, %29, %30 : vector<8x1xi32>
    %c-100_i32 = arith.constant -100 : i32
    %32 = vector.broadcast %c-100_i32 : i32 to vector<8x1xi32>
    %33 = arith.cmpi ne, %1, %32 : vector<8x1xi32>
    %34 = arith.andi %31, %33 : vector<8x1xi1>
    %cst_9 = arith.constant 0.000000e+00 : f32
    %35 = vector.broadcast %cst_9 : f32 to vector<8x1xf32>
    %36 = arith.subf %35, %25 : vector<8x1xf32>
    %cst_10 = arith.constant 0.000000e+00 : f32
    %37 = vector.broadcast %cst_10 : f32 to vector<8x1xf32>
    %38 = arith.select %34, %36, %37 : vector<8x1xi1>, vector<8x1xf32>
    %39 = vector.shape_cast %38 : vector<8x1xf32> to vector<1x8x1xf32>
    %cst_11 = arith.constant dense<0.000000e+00> : vector<1xf32>
    %40 = vector.multi_reduction <add>, %39, %cst_11 [1, 2] : vector<1x8x1xf32> to vector<1xf32>
    %41 = vector.shape_cast %40 : vector<1xf32> to vector<1x1x1xf32>
    %42 = vector.extract %41[0, 0, 0] : f32 from vector<1x1x1xf32>
    %cst_12 = arith.constant 1.000000e+00 : f32
    %cst_13 = arith.constant 0.000000e+00 : f32
    %43 = vector.broadcast %cst_12 : f32 to vector<8x1xf32>
    %44 = vector.broadcast %cst_13 : f32 to vector<8x1xf32>
    %45 = arith.select %34, %43, %44 : vector<8x1xi1>, vector<8x1xf32>
    %46 = vector.shape_cast %45 : vector<8x1xf32> to vector<1x8x1xf32>
    %cst_14 = arith.constant dense<0.000000e+00> : vector<1xf32>
    %47 = vector.multi_reduction <add>, %46, %cst_14 [1, 2] : vector<1x8x1xf32> to vector<1xf32>
    %48 = vector.shape_cast %47 : vector<1xf32> to vector<1x1x1xf32>
    %49 = vector.extract %48[0, 0, 0] : f32 from vector<1x1x1xf32>
    %50 = tpu.iota {dimensions = array<i32: 1>} : vector<1x128xi32>
    %c0_i32 = arith.constant 0 : i32
    %51 = vector.broadcast %c0_i32 : i32 to vector<1x128xi32>
    %52 = arith.cmpi eq, %50, %51 : vector<1x128xi32>
    %c1_i32 = arith.constant 1 : i32
    %53 = vector.broadcast %c1_i32 : i32 to vector<1x128xi32>
    %54 = arith.cmpi eq, %50, %53 : vector<1x128xi32>
    %cst_15 = arith.constant 0.000000e+00 : f32
    %55 = vector.broadcast %49 : f32 to vector<1x128xf32>
    %56 = vector.broadcast %cst_15 : f32 to vector<1x128xf32>
    %57 = arith.select %54, %55, %56 : vector<1x128xi1>, vector<1x128xf32>
    %58 = vector.broadcast %42 : f32 to vector<1x128xf32>
    %59 = arith.select %52, %58, %57 : vector<1x128xi1>, vector<1x128xf32>
    %60 = vector.shape_cast %59 : vector<1x128xf32> to vector<1x128xf32>
    %61 = vector.broadcast %60 : vector<1x128xf32> to vector<8x128xf32>
    %c0_16 = arith.constant 0 : index
    %c0_17 = arith.constant 0 : index
    %62 = vector.load %arg3[%c0_16, %c0_17] : memref<8x128xf32, #tpu.memory_space<vmem>>, vector<8x128xf32>
    tpu.vector_store %arg3[%c0_16, %c0_17], %61 {strides = array<i32>} : memref<8x128xf32, #tpu.memory_space<vmem>>, vector<8x128xf32>,
    return
  }
  func.func @transform_0(%arg0: i32) -> (i32, i32) {
    %c0_i32 = arith.constant 0 : i32
    %c0_i32_0 = arith.constant 0 : i32
    return %arg0, %c0_i32 : i32, i32
  }
  func.func @transform_1(%arg0: i32) -> (i32, i32) {
    %c0_i32 = arith.constant 0 : i32
    %c0_i32_0 = arith.constant 0 : i32
    return %arg0, %c0_i32 : i32, i32
  }
  func.func @transform_2(%arg0: i32) -> (i32, i32) {
    %c0_i32 = arith.constant 0 : i32
    %c0_i32_0 = arith.constant 0 : i32
    return %arg0, %c0_i32 : i32, i32
  }
}

</mosaic_0001>

<bundles_post_ra>
// kernel: tpu_custom_call.1
= control target key start
LH: loop header
LB: loop body
LE: loop exit
PB: predicated region body
PF: predicated region fallthrough
CT: control target
= control target key end

     0   :  { %vm14_vm0 = vcmask 130048   ;;  %s175_s0 = inlined_call_operand.vmem [shape: f32[8,16], index: 0, kind: input, shape index: {}]   ;;  %s176_s1 = inlined_call_operand.vmem [shape: s32[8,1], index: 1, kind: input, shape index: {}]   ;;  %s177_s2 = inlined_call_operand.hbm [shape: f32[8,128], index: 2, kind: output, shape index: {}]  }
   0x1   :  { %v12_v0 = vld [vmem:[%s175_s0] sm:$0xff] }
   0x2   :  { %7 = vsyncpa [#allocation3], 0  ;;  %v15_v1 = vsel %vm14_vm0, %v12_v0, -inf  ;;  %v136_v2 = vmov 0   ;;  %v13_v3 = vld [vmem:[%s176_s1] sm:$0xff]  ;;  %v18_v6 = vlaneseq  ;;  %vm53_vm3 = vcmask 7168  }
   0x3   :  { %103 = vset.pattern.permute.xlu0 %v136_v2  ;;  %vm49_vm2 = vcmp.ne.s32.totalorder %v13_v3, 4294967196  ;;  %v137_v27 = vmov 0.0   ;;  %s138_s1 = smov [#allocation2]  }
   0x4   :  { %16 = vmax.xlane.f32.xlu0 %v15_v1  ;;  %v19_v8 = vand.u32 127, %v18_v6  ;;  %v64_v28 = vsel %vm49_vm2, 1.0, %v137_v27  ;;  %s88_s13 = sshll.u32 %s138_s1, 4  ;;  %s89_s13 = int_to_ptr.vmem [resolvable:$true] %s88_s13 }
   0x5   :  { %v65_v30 = vsel %vm53_vm3, %v64_v28, 0.0  ;;  %s112_s15 = scalar_lea.vmem %s89_s13, 128  ;;  %p117_p1 = scmp.lt.s32.totalorder %s89_s13, %s89_s13 }
   0x6   :  { %vm76_vm4 = vcmp.eq.s32.totalorder %v19_v8, 1  ;;  %vm75_vm5 = vcmp.eq.s32.totalorder %v19_v8, 0  ;;  %p113_p0 = scmp.ne.s32.totalorder %s89_s13, %s112_s15  ;;  %p118_p2 = scmp.lt.s32.totalorder %s112_s15, %s112_s15 }
   0x8   :  { %p119_p3 = por %p118_p2, %p117_p1 }
   0xa   :  { %p120_p4 = pnand %p119_p3, %p113_p0 }
  0x1a   :  { %21 = vperm.xlu0 %103, %v13_v3  }
  0x91   :  { %v17_v4 = vpop.xlane.xlu0 %16 }
  0x92   :  { %v28_v5 = vsub.f32 %v12_v0, %v17_v4 }
  0x94   :  { %v29_v7 = vmul.f32 1.442695, %v28_v5 }
  0x96   :  { %104 = vpow2.f32 %v29_v7 }
  0x99   :  { %v22_v9 = vpop.permute.xlu0 %21 }
  0x9a   :  { %vm23_vm1 = vcmp.eq.s32.totalorder %v19_v8, %v22_v9 }
  0x9b   :  { %v24_v10 = vsel %vm23_vm1, %v12_v0, -3.4028235e+38 }
  0x9c   :  { %v25_v11 = vsel %vm14_vm0, %v24_v10, -inf }
  0x9d   :  { %26 = vmax.xlane.f32.xlu1 %v25_v11 }
  0xa0   :  { %v105_v12 = vpop.eup %104 }
  0xa1   :  { %v31_v13 = vsel %vm14_vm0, %v105_v12, 0.0 }
  0xa2   :  { %32 = vadd.xlane.f32.xlu1 %v31_v13 }
 0x12a   :  { %v27_v14 = vpop.xlane.xlu1 %26 }
 0x12b   :  { %v34_v15 = vsub.f32 %v27_v14, %v17_v4 }
 0x12d   :  { %v35_v16 = vmul.f32 1.442695, %v34_v15 }
 0x12f   :  { %106 = vpow2.f32 %v35_v16  ;;  %v33_v17 = vpop.xlane.xlu1 %32 }
 0x130   :  { %108 = vrcp.f32 %v33_v17 }
 0x139   :  { %v107_v18 = vpop.eup %106 }
 0x13a   :  { %v109_v19 = vpop.eup %108 }
 0x13b   :  { %v38_v20 = vmul.f32 %v109_v19, %v107_v18 }
 0x13d   :  { %v39_v21 = vsub.f32 1.0, %v38_v20 }
 0x13f   :  { %v40_v22 = vadd.f32 0.0001, %v39_v21 }
 0x141   :  { %110 = vlog2.f32 %v40_v22 }
 0x14b   :  { %v111_v23 = vpop.eup %110 }
 0x14c   :  { %v42_v24 = vmul.f32 0.6931472, %v111_v23 }
 0x14e   :  { %v51_v25 = vsub.f32 0.0, %v42_v24 }
 0x150   :  { %v52_v26 = vsel %vm49_vm2, %v51_v25, 0.0 }
 0x151   :  { %v54_v29 = vsel %vm53_vm3, %v52_v26, 0.0 }
 0x152   :  { %55 = vadd.xlane.f32.xlu1 %v54_v29 }
 0x156   :  { %66 = vadd.xlane.f32.xlu1 %v65_v30 }
 0x1df   :  { %v56_v31 = vpop.xlane.xlu1 %55 }
 0x1e0   :  { %v57_v32 = vrot.slane %v56_v31, 4 }
 0x1e2   :  { %v58_v33 = vadd.f32 %v57_v32, %v56_v31 }
 0x1e3   :  { %v67_v34 = vpop.xlane.xlu1 %66 }
 0x1e4   :  { %v59_v35 = vrot.slane %v58_v33, 2  ;;  %v68_v36 = vrot.slane %v67_v34, 4 }
 0x1e6   :  { %v69_v37 = vadd.f32 %v68_v36, %v67_v34  ;;  %v60_v38 = vadd.f32 %v59_v35, %v58_v33 }
 0x1e8   :  { %v70_v39 = vrot.slane %v69_v37, 2  ;;  %v61_v40 = vrot.slane %v60_v38, 1 }
 0x1ea   :  { %v71_v41 = vadd.f32 %v70_v39, %v69_v37  ;;  %v62_v42 = vadd.f32 %v61_v40, %v60_v38 }
 0x1ec   :  { %96 = vpush %v62_v42  ;;  %v72_v43 = vrot.slane %v71_v41, 1 }
 0x1ee   :  { %v73_v44 = vadd.f32 %v72_v43, %v71_v41 }
 0x1f0   :  { %98 = vpush %v73_v44 }
 0x21d   :  { %s97_s0 = spop %96 }
 0x21e   :  { %v79_v46 = vstv %s97_s0 }
 0x221   :  { %s99_s14 = spop %98 }
 0x222   :  { %v77_v45 = vstv %s99_s14 }
 0x223   :  { %v78_v47 = vsel %vm76_vm4, %v77_v45, 0.0 }
 0x224   :  { %v80_v48 = vsel %vm75_vm5, %v79_v46, %v78_v47 }
 0x225   :  { %81 = vst [vmem:[#allocation2] sm:$0xff] %v80_v48 }
 0x226   :  { %123 = shalt.err (!%p120_p4)
}
 0x227   :  { %s124_s18 = scalar_lea.hbm %s177_s2, 128 }
 0x228   :  { %p125_p5 = scmp.ne.s32.totalorder %s177_s2, %s124_s18  ;;  %p128_p6 = scmp.lt.u32.totalorder %s124_s18, %s177_s2 }
 0x22a   :  { %p130_p7 = pnand %p128_p6, %p125_p5 }
 0x22c   :  { %133 = shalt.err (!%p130_p7)
}
 0x22d   :  { %91 = dma.vmem_to_hbm [thread:$0]  %s89_s13, 128, %s177_s2, [#allocation3]  }
 0x22e   :  { %134 = dma.done.wait [#allocation3], 128  }
 0x22f   :  { %135 = vsyncadd [#allocation3], 4294967168 }
 0x230   :  { %95 = vsyncpa [#allocation3], 1 }

</bundles_post_ra>
